<compile_context>
chip_gen: v7x
topology: tpu7x:2x2x1
jax: 0.10.0
libtpu: 0.0.40
codegen_flags: <defaults>
</compile_context>

<pallas_src>
import functools

import jax
import jax.numpy as jnp
from jax.experimental import pallas as pl
from jax.experimental.pallas import tpu as pltpu


def _round_up(x, m):
    return ((x + m - 1) // m) * m


def _sublane(itemsize):
    if itemsize >= 4:
        return 8
    if itemsize == 2:
        return 16
    return 32


def _vmem_capacity_bytes():
    cap = 64 * 1024 * 1024  # conservative default (v7x per-TC VMEM)
    try:
        cap = int(pltpu.get_tpu_info().vmem_capacity_bytes)
    except Exception:
        pass
    try:
        # If the query reports per-chip rather than per-TC VMEM on v7x, clamp
        # to the 64 MiB per-TC budget (the row axis is sharded across TCs).
        if "v7" in jax.devices()[0].device_kind.lower():
            cap = min(cap, 64 * 1024 * 1024)
    except Exception:
        pass
    return cap


def _prefer_native_bf16_math():
    # bf16 VALU/EUP exist on v6e/v7x; on v5e (and older) keep f32 math — it is
    # fully hidden under the HBM roofline there and bf16 math would add casts.
    try:
        kind = jax.devices()[0].device_kind.lower()
        return ("v6" in kind) or ("v7" in kind)
    except Exception:
        return False


def _choose_tiles(k, in_itemsize, compute_itemsize, vmem_bytes, has_weight):
    """Pick (row tile tn, class chunk kc) from the device VMEM budget."""
    sub = _sublane(in_itemsize)
    budget = int(vmem_bytes * 0.75)  # headroom for Mosaic scratch / semaphores

    def tn_for(kc):
        kc_pad = _round_up(max(kc, 1), 128)                 # lane padding
        per_row = (2 * 2 * kc_pad * in_itemsize             # logits+targets, 2x buffered
                   + 4 * kc_pad * compute_itemsize          # in-kernel (tn,kc) temporaries
                   + 6 * 128 * 4)                           # 4 f32 scratch cols + 2 out bufs
        fixed = (2 * 8 * kc_pad * 4) if has_weight else 0   # (1,kc) weights, padded+buffered
        return max(((budget - fixed) // per_row // sub) * sub, 0)

    kc = k
    tn = tn_for(kc)
    if tn < 256 and k > 2048:
        # Vocab-scale K: lane-aligned chunks so the row tile stays >= 256; the
        # reduction is carried across chunks by the online-LSE accumulators.
        kc = 4096
        while kc > 128 and tn_for(kc) < 256:
            kc //= 2
        tn = tn_for(kc)
    return max(tn, sub), kc


def _soft_ce_kernel(*refs, use_weight, native_math):
    """One (tn, kc) tile: online log-sum-exp + fused weighted reduction over K.

    refs: x, t, [w], loss_out, then f32 (tn,1) scratch: m, l, sum(tw), sum(tw*(x-m)).
    """
    if use_weight:
        x_ref, t_ref, w_ref, loss_ref, m_sc, l_sc, stw_sc, sxc_sc = refs
    else:
        x_ref, t_ref, loss_ref, m_sc, l_sc, stw_sc, sxc_sc = refs
        w_ref = None

    kk = pl.program_id(1)

    @pl.when(kk == 0)
    def _():
        m_sc[...] = jnp.full(m_sc.shape, -jnp.inf, m_sc.dtype)
        l_sc[...] = jnp.zeros(l_sc.shape, l_sc.dtype)
        stw_sc[...] = jnp.zeros(stw_sc.shape, stw_sc.dtype)
        sxc_sc[...] = jnp.zeros(sxc_sc.shape, sxc_sc.dtype)

    # Elementwise math in bf16 on chips with bf16 VALU/EUP, f32 otherwise.
    # Row accumulators are always f32.
    cdt = x_ref.dtype if native_math else jnp.float32
    x = x_ref[...].astype(cdt)                                  # (tn, kc)
    tw = t_ref[...].astype(cdt)
    if use_weight:
        tw = tw * w_ref[...].astype(cdt)                        # broadcast (1, kc)

    m_old = m_sc[...]                                           # (tn, 1) f32
    m_new = jnp.maximum(
        m_old, jnp.max(x, axis=-1, keepdims=True).astype(jnp.float32))
    # Clamp so the first step (m_old = -inf, zero accumulators) never forms 0*inf.
    delta = jnp.maximum(m_old - m_new, jnp.float32(-1e30))      # <= 0

    xc = x - m_new.astype(cdt)                                  # centered logits, <= 0
    l_sc[...] = (l_sc[...] * jnp.exp(delta)
                 + jnp.sum(jnp.exp(xc).astype(jnp.float32), axis=-1, keepdims=True))
    # sum tw*(x - m_new) == previous sum rebased from m_old to m_new + this chunk.
    sxc_sc[...] = (sxc_sc[...] + stw_sc[...] * delta
                   + jnp.sum((tw * xc).astype(jnp.float32), axis=-1, keepdims=True))
    stw_sc[...] = stw_sc[...] + jnp.sum(tw.astype(jnp.float32), axis=-1,
                                        keepdims=True)
    m_sc[...] = m_new

    @pl.when(kk == pl.num_programs(1) - 1)
    def _():
        # loss = sum_k tw*(lse - x) = log(l)*sum(tw) - sum(tw*(x-m)),  lse = m + log(l)
        loss_ref[...] = jnp.log(l_sc[...]) * stw_sc[...] - sxc_sc[...]


@functools.partial(jax.jit, static_argnames=("reduction", "row_tile", "k_tile"))
def soft_cross_entropy_loss(logits, target, weight=None,
                            reduction="elementwise_mean",
                            row_tile=None, k_tile=None):
    n, k = logits.shape
    assert target.shape == (n, k)
    if reduction not in ("none", "sum", "elementwise_mean"):
        raise ValueError(f"Unrecognized reduction: {reduction}")

    use_weight = weight is not None
    native_math = (logits.dtype == jnp.bfloat16
                   and target.dtype == jnp.bfloat16
                   and _prefer_native_bf16_math())
    compute_dtype = logits.dtype if native_math else jnp.float32

    vmem_bytes = _vmem_capacity_bytes()
    in_itemsize = max(jnp.dtype(logits.dtype).itemsize,
                      jnp.dtype(target.dtype).itemsize)
    sub = _sublane(in_itemsize)

    tn, kc = _choose_tiles(k, in_itemsize, jnp.dtype(compute_dtype).itemsize,
                           vmem_bytes, use_weight)
    if row_tile is not None:
        tn = _round_up(int(row_tile), sub)
    if k_tile is not None:
        kc = min(_round_up(int(k_tile), 128), _round_up(k, 128))

    # --- row tiling (pad rows with zeros: zero soft targets -> zero loss) ---
    n_ceil = _round_up(n, sub)
    tn = min(tn, n_ceil)
    if row_tile is None:
        nt = -(-n_ceil // tn)
        # v7x megacore: keep >= 2 row tiles when the batch can amortize a step.
        if nt == 1 and n_ceil >= max(2 * sub, 64):
            nt = 2
        # Balance tiles to minimize zero-row padding.
        tn = _round_up(-(-n_ceil // nt), sub)
    n_pad = _round_up(n, tn)
    num_row_tiles = n_pad // tn

    # --- K tiling (pad classes with very-negative logits / zero targets) ---
    if kc >= k:
        kc, k_pad = k, k
    else:
        kc = _round_up(kc, 128)  # lane-aligned chunks when splitting K
        k_pad = _round_up(k, kc)
    num_k_tiles = k_pad // kc

    if n_pad != n:
        logits = jnp.pad(logits, ((0, n_pad - n), (0, 0)))
        target = jnp.pad(target, ((0, n_pad - n), (0, 0)))
    if k_pad != k:
        neg = -3.0e4 if logits.dtype == jnp.float16 else -1.0e30
        logits = jnp.pad(logits, ((0, 0), (0, k_pad - k)), constant_values=neg)
        target = jnp.pad(target, ((0, 0), (0, k_pad - k)))

    in_specs = [pl.BlockSpec((tn, kc), lambda i, j: (i, j)),
                pl.BlockSpec((tn, kc), lambda i, j: (i, j))]
    operands = [logits, target]
    if use_weight:
        # Pre-cast once in the wrapper so the kernel never re-casts per step.
        w2d = jnp.asarray(weight).reshape(1, k).astype(compute_dtype)
        if k_pad != k:
            w2d = jnp.pad(w2d, ((0, 0), (0, k_pad - k)))
        in_specs.append(pl.BlockSpec((1, kc), lambda i, j: (0, j)))
        operands.append(w2d)

    kernel = functools.partial(_soft_ce_kernel, use_weight=use_weight,
                               native_math=native_math)

    out = pl.pallas_call(
        kernel,
        out_shape=jax.ShapeDtypeStruct((n_pad, 1), jnp.float32),
        grid_spec=pltpu.PrefetchScalarGridSpec(
            num_scalar_prefetch=0,
            grid=(num_row_tiles, num_k_tiles),
            in_specs=in_specs,
            # (tn, 1) blocks match the natural layout of the row reduction;
            # the block is revisited across K and written on the last K step.
            out_specs=pl.BlockSpec((tn, 1), lambda i, j: (i, 0)),
            scratch_shapes=[pltpu.VMEM((tn, 1), jnp.float32)] * 4,
        ),
        compiler_params=pltpu.CompilerParams(
            # Rows are independent (v7x megacore shardable); K carries the
            # online-LSE accumulators, so it is the last, "arbitrary" axis.
            dimension_semantics=("parallel", "arbitrary"),
            vmem_limit_bytes=int(vmem_bytes * 0.8),
        ),
    )(*operands)

    per_row = out[:n, 0]
    if reduction == "none":
        return per_row
    if reduction == "sum":
        return jnp.sum(per_row)
    return jnp.sum(per_row) / jnp.float32(n)


def _reference(logits, target, weight, reduction):
    logp = jax.nn.log_softmax(logits.astype(jnp.float32), axis=-1)
    if weight is None:
        w = jnp.ones((logits.shape[1],), jnp.float32)
    else:
        w = jnp.asarray(weight).astype(jnp.float32)
    per_row = jnp.sum(target.astype(jnp.float32) * w[None, :] * (-logp), axis=-1)
    if reduction == "none":
        return per_row
    if reduction == "sum":
        return jnp.sum(per_row)
    return jnp.mean(per_row)


if __name__ == "__main__":
    key = jax.random.PRNGKey(0)
    ok = True

    # 1) Small f32 case, weighted, all reductions.
    N, K = 8, 8
    k1, k2 = jax.random.split(key)
    logits = jax.random.normal(k1, (N, K), dtype=jnp.float32)
    target = jax.nn.softmax(jax.random.normal(k2, (N, K), dtype=jnp.float32), axis=-1)
    weight = jnp.linspace(0.5, 1.5, K, dtype=jnp.float32)
    for red in ("elementwise_mean", "sum", "none"):
        out = jax.block_until_ready(
            soft_cross_entropy_loss(logits, target, weight, reduction=red))
        ref = _reference(logits, target, weight, red)
        if not jnp.allclose(out, ref, atol=1e-5, rtol=1e-5):
            ok = False
            print(f"MISMATCH reduction={red}: {out} vs {ref}")

    # 2) bf16 inputs: native-dtype HBM reads; bf16 elementwise math on v6e/v7x.
    lb, tb = logits.astype(jnp.bfloat16), target.astype(jnp.bfloat16)
    out = jax.block_until_ready(
        soft_cross_entropy_loss(lb, tb, weight, reduction="none"))
    ref = _reference(lb, tb, weight, "none")
    if not jnp.allclose(out, ref, atol=5e-2, rtol=5e-2):
        ok = False
        print(f"MISMATCH bf16: {out} vs {ref}")

    # 3) Ragged N, multiple row tiles, unweighted (specialized no-weight kernel).
    N2, K2 = 20, 16
    k3, k4 = jax.random.split(k1)
    lg2 = jax.random.normal(k3, (N2, K2), dtype=jnp.float32)
    tg2 = jax.nn.softmax(jax.random.normal(k4, (N2, K2), dtype=jnp.float32), axis=-1)
    out = jax.block_until_ready(
        soft_cross_entropy_loss(lg2, tg2, None, reduction="none", row_tile=8))
    ref = _reference(lg2, tg2, None, "none")
    if not jnp.allclose(out, ref, atol=1e-5, rtol=1e-5):
        ok = False
        print(f"MISMATCH ragged: {out} vs {ref}")

    # 4) Forced K split: exercises the online-LSE accumulators + class padding.
    N3, K3 = 24, 300
    k5, k6 = jax.random.split(k2)
    lg3 = 4.0 * jax.random.normal(k5, (N3, K3), dtype=jnp.float32)
    tg3 = jax.nn.softmax(jax.random.normal(k6, (N3, K3), dtype=jnp.float32), axis=-1)
    w3 = jnp.linspace(0.25, 2.0, K3, dtype=jnp.float32)
    out = jax.block_until_ready(
        soft_cross_entropy_loss(lg3, tg3, w3, reduction="none", k_tile=128))
    ref = _reference(lg3, tg3, w3, "none")
    if not jnp.allclose(out, ref, atol=1e-4, rtol=1e-4):
        ok = False
        print(f"MISMATCH k-split: {out} vs {ref}")

    if ok:
        print("KERNEL_OK")
</pallas_src>

<mosaic_0001>
module attributes {stable_mosaic.version = 11 : i64} {
  func.func @_soft_ce_kernel(%arg0: i32, %arg1: i32, %arg2: memref<8x8xf32, #tpu.memory_space<vmem>>, %arg3: memref<8x8xf32, #tpu.memory_space<vmem>>, %arg4: memref<1x8xf32, #tpu.memory_space<vmem>>, %arg5: memref<8x1xf32, #tpu.memory_space<vmem>>, %arg6: memref<8x1xf32, #tpu.memory_space<vmem>>, %arg7: memref<8x1xf32, #tpu.memory_space<vmem>>, %arg8: memref<8x1xf32, #tpu.memory_space<vmem>>, %arg9: memref<8x1xf32, #tpu.memory_space<vmem>>) attributes {dimension_semantics = [#tpu.dimension_semantics<parallel>, #tpu.dimension_semantics<arbitrary>], iteration_bounds = array<i64: 1, 1>, scalar_prefetch = 0 : i64, scratch_operands = 4 : i64, tpu.core_type = #tpu.core_type<tc>, window_params = [{transform_indices = @transform_0, window_bounds = array<i64: 8, 8>}, {transform_indices = @transform_1, window_bounds = array<i64: 8, 8>}, {transform_indices = @transform_2, window_bounds = array<i64: 1, 8>}, {transform_indices = @transform_3, window_bounds = array<i64: 8, 1>}]} {
    %c0_i32 = arith.constant 0 : i32
    %0 = arith.cmpi eq, %arg1, %c0_i32 : i32
    %1 = arith.extui %0 : i1 to i32
    %c0_i32_0 = arith.constant 0 : i32
    %2 = arith.cmpi ne, %1, %c0_i32_0 : i32
    scf.if %2 {
      %cst_30 = arith.constant 0xFF800000 : f32
      %43 = vector.broadcast %cst_30 : f32 to vector<8x1xf32>
      %c0_31 = arith.constant 0 : index
      %c0_32 = arith.constant 0 : index
      %44 = vector.load %arg6[%c0_31, %c0_32] : memref<8x1xf32, #tpu.memory_space<vmem>>, vector<8x1xf32>
      tpu.vector_store %arg6[%c0_31, %c0_32], %43 {strides = array<i32>} : memref<8x1xf32, #tpu.memory_space<vmem>>, vector<8x1xf32>,
      %cst_33 = arith.constant 0.000000e+00 : f32
      %45 = vector.broadcast %cst_33 : f32 to vector<8x1xf32>
      %c0_34 = arith.constant 0 : index
      %c0_35 = arith.constant 0 : index
      %46 = vector.load %arg7[%c0_34, %c0_35] : memref<8x1xf32, #tpu.memory_space<vmem>>, vector<8x1xf32>
      tpu.vector_store %arg7[%c0_34, %c0_35], %45 {strides = array<i32>} : memref<8x1xf32, #tpu.memory_space<vmem>>, vector<8x1xf32>,
      %cst_36 = arith.constant 0.000000e+00 : f32
      %47 = vector.broadcast %cst_36 : f32 to vector<8x1xf32>
      %c0_37 = arith.constant 0 : index
      %c0_38 = arith.constant 0 : index
      %48 = vector.load %arg8[%c0_37, %c0_38] : memref<8x1xf32, #tpu.memory_space<vmem>>, vector<8x1xf32>
      tpu.vector_store %arg8[%c0_37, %c0_38], %47 {strides = array<i32>} : memref<8x1xf32, #tpu.memory_space<vmem>>, vector<8x1xf32>,
      %cst_39 = arith.constant 0.000000e+00 : f32
      %49 = vector.broadcast %cst_39 : f32 to vector<8x1xf32>
      %c0_40 = arith.constant 0 : index
      %c0_41 = arith.constant 0 : index
      %50 = vector.load %arg9[%c0_40, %c0_41] : memref<8x1xf32, #tpu.memory_space<vmem>>, vector<8x1xf32>
      tpu.vector_store %arg9[%c0_40, %c0_41], %49 {strides = array<i32>} : memref<8x1xf32, #tpu.memory_space<vmem>>, vector<8x1xf32>,
    } else {
    }
    %c0 = arith.constant 0 : index
    %c0_1 = arith.constant 0 : index
    %3 = vector.load %arg2[%c0, %c0_1] : memref<8x8xf32, #tpu.memory_space<vmem>>, vector<8x8xf32>
    %c0_2 = arith.constant 0 : index
    %c0_3 = arith.constant 0 : index
    %4 = vector.load %arg3[%c0_2, %c0_3] : memref<8x8xf32, #tpu.memory_space<vmem>>, vector<8x8xf32>
    %c0_4 = arith.constant 0 : index
    %c0_5 = arith.constant 0 : index
    %5 = vector.load %arg4[%c0_4, %c0_5] : memref<1x8xf32, #tpu.memory_space<vmem>>, vector<1x8xf32>
    %6 = vector.broadcast %5 : vector<1x8xf32> to vector<8x8xf32>
    %7 = arith.mulf %4, %6 : vector<8x8xf32>
    %c0_6 = arith.constant 0 : index
    %c0_7 = arith.constant 0 : index
    %8 = vector.load %arg6[%c0_6, %c0_7] : memref<8x1xf32, #tpu.memory_space<vmem>>, vector<8x1xf32>
    %cst = arith.constant dense<0xFF800000> : vector<8xf32>
    %9 = vector.multi_reduction <maximumf>, %3, %cst [1] : vector<8x8xf32> to vector<8xf32>
    %10 = vector.shape_cast %9 : vector<8xf32> to vector<8x1xf32>
    %11 = arith.maximumf %8, %10 : vector<8x1xf32>
    %12 = arith.subf %8, %11 : vector<8x1xf32>
    %cst_8 = arith.constant -1.000000e+30 : f32
    %13 = vector.broadcast %cst_8 : f32 to vector<8x1xf32>
    %14 = arith.maximumf %12, %13 : vector<8x1xf32>
    %15 = vector.broadcast %11 : vector<8x1xf32> to vector<8x8xf32>
    %16 = arith.subf %3, %15 : vector<8x8xf32>
    %c0_9 = arith.constant 0 : index
    %c0_10 = arith.constant 0 : index
    %17 = vector.load %arg7[%c0_9, %c0_10] : memref<8x1xf32, #tpu.memory_space<vmem>>, vector<8x1xf32>
    %18 = math.exp %14 : vector<8x1xf32>
    %19 = arith.mulf %17, %18 : vector<8x1xf32>
    %20 = math.exp %16 : vector<8x8xf32>
    %cst_11 = arith.constant dense<0.000000e+00> : vector<8xf32>
    %21 = vector.multi_reduction <add>, %20, %cst_11 [1] : vector<8x8xf32> to vector<8xf32>
    %22 = vector.shape_cast %21 : vector<8xf32> to vector<8x1xf32>
    %23 = arith.addf %19, %22 : vector<8x1xf32>
    %c0_12 = arith.constant 0 : index
    %c0_13 = arith.constant 0 : index
    %24 = vector.load %arg7[%c0_12, %c0_13] : memref<8x1xf32, #tpu.memory_space<vmem>>, vector<8x1xf32>
    tpu.vector_store %arg7[%c0_12, %c0_13], %23 {strides = array<i32>} : memref<8x1xf32, #tpu.memory_space<vmem>>, vector<8x1xf32>,
    %c0_14 = arith.constant 0 : index
    %c0_15 = arith.constant 0 : index
    %25 = vector.load %arg9[%c0_14, %c0_15] : memref<8x1xf32, #tpu.memory_space<vmem>>, vector<8x1xf32>
    %c0_16 = arith.constant 0 : index
    %c0_17 = arith.constant 0 : index
    %26 = vector.load %arg8[%c0_16, %c0_17] : memref<8x1xf32, #tpu.memory_space<vmem>>, vector<8x1xf32>
    %27 = arith.mulf %26, %14 : vector<8x1xf32>
    %28 = arith.addf %25, %27 : vector<8x1xf32>
    %29 = arith.mulf %7, %16 : vector<8x8xf32>
    %cst_18 = arith.constant dense<0.000000e+00> : vector<8xf32>
    %30 = vector.multi_reduction <add>, %29, %cst_18 [1] : vector<8x8xf32> to vector<8xf32>
    %31 = vector.shape_cast %30 : vector<8xf32> to vector<8x1xf32>
    %32 = arith.addf %28, %31 : vector<8x1xf32>
    %c0_19 = arith.constant 0 : index
    %c0_20 = arith.constant 0 : index
    %33 = vector.load %arg9[%c0_19, %c0_20] : memref<8x1xf32, #tpu.memory_space<vmem>>, vector<8x1xf32>
    tpu.vector_store %arg9[%c0_19, %c0_20], %32 {strides = array<i32>} : memref<8x1xf32, #tpu.memory_space<vmem>>, vector<8x1xf32>,
    %c0_21 = arith.constant 0 : index
    %c0_22 = arith.constant 0 : index
    %34 = vector.load %arg8[%c0_21, %c0_22] : memref<8x1xf32, #tpu.memory_space<vmem>>, vector<8x1xf32>
    %cst_23 = arith.constant dense<0.000000e+00> : vector<8xf32>
    %35 = vector.multi_reduction <add>, %7, %cst_23 [1] : vector<8x8xf32> to vector<8xf32>
    %36 = vector.shape_cast %35 : vector<8xf32> to vector<8x1xf32>
    %37 = arith.addf %34, %36 : vector<8x1xf32>
    %c0_24 = arith.constant 0 : index
    %c0_25 = arith.constant 0 : index
    %38 = vector.load %arg8[%c0_24, %c0_25] : memref<8x1xf32, #tpu.memory_space<vmem>>, vector<8x1xf32>
    tpu.vector_store %arg8[%c0_24, %c0_25], %37 {strides = array<i32>} : memref<8x1xf32, #tpu.memory_space<vmem>>, vector<8x1xf32>,
    %c0_26 = arith.constant 0 : index
    %c0_27 = arith.constant 0 : index
    %39 = vector.load %arg6[%c0_26, %c0_27] : memref<8x1xf32, #tpu.memory_space<vmem>>, vector<8x1xf32>
    tpu.vector_store %arg6[%c0_26, %c0_27], %11 {strides = array<i32>} : memref<8x1xf32, #tpu.memory_space<vmem>>, vector<8x1xf32>,
    %c0_i32_28 = arith.constant 0 : i32
    %40 = arith.cmpi eq, %arg1, %c0_i32_28 : i32
    %41 = arith.extui %40 : i1 to i32
    %c0_i32_29 = arith.constant 0 : i32
    %42 = arith.cmpi ne, %41, %c0_i32_29 : i32
    scf.if %42 {
      %c0_30 = arith.constant 0 : index
      %c0_31 = arith.constant 0 : index
      %43 = vector.load %arg7[%c0_30, %c0_31] : memref<8x1xf32, #tpu.memory_space<vmem>>, vector<8x1xf32>
      %44 = math.log %43 : vector<8x1xf32>
      %c0_32 = arith.constant 0 : index
      %c0_33 = arith.constant 0 : index
      %45 = vector.load %arg8[%c0_32, %c0_33] : memref<8x1xf32, #tpu.memory_space<vmem>>, vector<8x1xf32>
      %46 = arith.mulf %44, %45 : vector<8x1xf32>
      %c0_34 = arith.constant 0 : index
      %c0_35 = arith.constant 0 : index
      %47 = vector.load %arg9[%c0_34, %c0_35] : memref<8x1xf32, #tpu.memory_space<vmem>>, vector<8x1xf32>
      %48 = arith.subf %46, %47 : vector<8x1xf32>
      %c0_36 = arith.constant 0 : index
      %c0_37 = arith.constant 0 : index
      %49 = vector.load %arg5[%c0_36, %c0_37] : memref<8x1xf32, #tpu.memory_space<vmem>>, vector<8x1xf32>
      tpu.vector_store %arg5[%c0_36, %c0_37], %48 {strides = array<i32>} : memref<8x1xf32, #tpu.memory_space<vmem>>, vector<8x1xf32>,
    } else {
    }
    return
  }
  func.func @transform_0(%arg0: i32, %arg1: i32) -> (i32, i32) {
    %c0_i32 = arith.constant 0 : i32
    return %arg0, %arg1 : i32, i32
  }
  func.func @transform_1(%arg0: i32, %arg1: i32) -> (i32, i32) {
    %c0_i32 = arith.constant 0 : i32
    return %arg0, %arg1 : i32, i32
  }
  func.func @transform_2(%arg0: i32, %arg1: i32) -> (i32, i32) {
    %c0_i32 = arith.constant 0 : i32
    %c0_i32_0 = arith.constant 0 : i32
    return %c0_i32, %arg1 : i32, i32
  }
  func.func @transform_3(%arg0: i32, %arg1: i32) -> (i32, i32) {
    %c0_i32 = arith.constant 0 : i32
    %c0_i32_0 = arith.constant 0 : i32
    return %arg0, %c0_i32 : i32, i32
  }
}

</mosaic_0001>

<bundles_post_ra>
// kernel: soft_cross_entropy_loss.1
= control target key start
LH: loop header
LB: loop body
LE: loop exit
PB: predicated region body
PF: predicated region fallthrough
CT: control target
= control target key end

     0   :  { %8 = vsyncpa [#allocation7], 0  ;;  %s246_s0 = inlined_call_operand.hbm [shape: f32[8,8], index: 0, kind: input, shape index: {}]   ;;  %s247_s1 = inlined_call_operand.hbm [shape: f32[8,8], index: 1, kind: input, shape index: {}]   ;;  %s248_s2 = inlined_call_operand.vmem [shape: f32[1,8], index: 2, kind: input, shape index: {}]   ;;  %s249_s3 = inlined_call_operand.vmem [shape: f32[8,1], index: 3, kind: output, shape index: {}]  }
   0x1   :  { %9 = vsyncpa [#allocation9], 0  ;;  %s178_s12 = smov [#allocation6]   ;;  %s179_s14 = smov [#allocation8]  }
   0x2   :  { %s16_s13 = sshll.u32 %s178_s12, 4  ;;  %s26_s15 = sshll.u32 %s179_s14, 4  ;;  %s17_s13 = int_to_ptr.vmem [resolvable:$true] %s16_s13  ;;  %s27_s15 = int_to_ptr.vmem [resolvable:$true] %s26_s15 }
   0x3   :  { %s130_s18 = scalar_lea.hbm %s246_s0, 128 }
   0x4   :  { %p131_p0 = scmp.ne.s32.totalorder %s246_s0, %s130_s18  ;;  %p134_p1 = scmp.lt.u32.totalorder %s130_s18, %s246_s0 }
   0x6   :  { %p136_p2 = pnand %p134_p1, %p131_p0 }
   0x8   :  { %139 = shalt.err (!%p136_p2)
}
   0x9   :  { %s140_s23 = scalar_lea.vmem %s17_s13, 128  ;;  %p145_p4 = scmp.lt.s32.totalorder %s17_s13, %s17_s13 }
   0xa   :  { %p141_p3 = scmp.ne.s32.totalorder %s17_s13, %s140_s23  ;;  %p146_p5 = scmp.lt.s32.totalorder %s140_s23, %s140_s23 }
   0xc   :  { %p147_p6 = por %p146_p5, %p145_p4 }
   0xe   :  { %p148_p7 = pnand %p147_p6, %p141_p3 }
  0x10   :  { %151 = shalt.err (!%p148_p7)
}
  0x11   :  { %19 = dma.hbm_to_vmem [thread:$0]  %s246_s0, 128, %s17_s13, [#allocation7]  }
  0x12   :  { %s152_s28 = scalar_lea.hbm %s247_s1, 128 }
  0x13   :  { %p153_p8 = scmp.ne.s32.totalorder %s247_s1, %s152_s28  ;;  %p156_p9 = scmp.lt.u32.totalorder %s152_s28, %s247_s1 }
  0x15   :  { %p158_p10 = pnand %p156_p9, %p153_p8 }
  0x17   :  { %161 = shalt.err (!%p158_p10)
}
  0x18   :  { %s162_s6 = scalar_lea.vmem %s27_s15, 128  ;;  %p167_p12 = scmp.lt.s32.totalorder %s27_s15, %s27_s15 }
  0x19   :  { %p163_p11 = scmp.ne.s32.totalorder %s27_s15, %s162_s6  ;;  %p168_p13 = scmp.lt.s32.totalorder %s162_s6, %s162_s6 }
  0x1b   :  { %p169_p0 = por %p168_p13, %p167_p12 }
  0x1d   :  { %p170_p1 = pnand %p169_p0, %p163_p11 }
  0x1f   :  { %173 = shalt.err (!%p170_p1)
}
  0x20   :  { %29 = dma.hbm_to_vmem [thread:$0]  %s247_s1, 128, %s27_s15, [#allocation9]  }
  0x21   :  { %174 = dma.done.wait [#allocation7], 128  }
  0x22   :  { %175 = vsyncadd [#allocation7], 4294967168 }
  0x23   :  { %176 = dma.done.wait [#allocation9], 128  }
  0x24   :  { %177 = vsyncadd [#allocation9], 4294967168  ;;  %vm42_vm0 = vcmask 7168   ;;  %v180_v0 = vmov -inf   ;;  %vm58_vm1 = vcmask 64512   ;;  %v47_v1 = vld [vmem:[#allocation6] sm:$0xff] }
  0x25   :  { %43 = vst.msk [vmem:[#allocation2] sm:$0xff] %vm42_vm0, %v180_v0  ;;  %v59_v2 = vsel %vm58_vm1, %v47_v1, -inf  ;;  %v181_v3 = vmov 0.0   ;;  %v182_v4 = vmov 0   ;;  %v48_v12 = vld [vmem:[#allocation8] sm:$0xff] }
  0x26   :  { %60 = vmax.xlane.f32.xlu0 %v59_v2  ;;  %44 = vst.msk [vmem:[#allocation3] sm:$0xff] %vm42_vm0, %v181_v3  ;;  %45 = vst.msk [vmem:[#allocation4] sm:$0xff] %vm42_vm0, %v181_v3  ;;  %v117_v13 = vld [vmem:[%s248_s2] ss:$0 sm:$0xff] }
  0x27   :  { %46 = vst.msk [vmem:[#allocation5] sm:$0xff] %vm42_vm0, %v181_v3  ;;  %123 = vset.pattern.permute.xlu0 %v182_v4  ;;  %v56_v16 = vmul.f32 %v117_v13, %v48_v12 }
  0x29   :  { %v94_v17 = vsel %vm58_vm1, %v56_v16, 0.0 }
  0x2c   :  { %v57_v5 = vld [vmem:[#allocation2] sm:$0xff] }
  0x2d   :  { %v71_v23 = vld [vmem:[#allocation3] sm:$0xff]  ;;  %v93_v26 = vld [vmem:[#allocation4] sm:$0xff] }
  0x2e   :  { %v83_v30 = vld [vmem:[#allocation5] sm:$0xff] }
  0xb3   :  { %v61_v6 = vpop.xlane.xlu0 %60 }
  0xb4   :  { %v62_v7 = vmax.f32 %v57_v5, %v61_v6 }
  0xb6   :  { %v63_v8 = vsub.f32 %v57_v5, %v62_v7  ;;  %99 = vst.msk [vmem:[#allocation2] sm:$0xff] %vm42_vm0, %v62_v7  ;;  %67 = vperm.xlu0 %123, %v62_v7  }
  0xb8   :  { %v64_v20 = vmax.f32 %v63_v8, -1e+30 }
  0xba   :  { %v72_v21 = vmul.f32 1.442695, %v64_v20  ;;  %v85_v28 = vmul.f32 %v93_v26, %v64_v20 }
  0xbc   :  { %v86_v32 = vadd.f32 %v85_v28, %v83_v30 }
 0x135   :  { %v68_v9 = vpop.permute.xlu0 %67 }
 0x136   :  { %v70_v10 = vsub.f32 %v47_v1, %v68_v9 }
 0x138   :  { %v75_v11 = vmul.f32 1.442695, %v70_v10  ;;  %v87_v18 = vmul.f32 %v70_v10, %v56_v16 }
 0x13a   :  { %124 = vpow2.f32 %v75_v11  ;;  %v88_v19 = vsel %vm58_vm1, %v87_v18, 0.0 }
 0x13b   :  { %126 = vpow2.f32 %v72_v21 }
 0x144   :  { %v125_v14 = vpop.eup %124 }
 0x145   :  { %v77_v15 = vsel %vm58_vm1, %v125_v14, 0.0  ;;  %v127_v22 = vpop.eup %126 }
 0x146   :  { %78 = vadd.xlane.f32.xlu1 %v77_v15  ;;  %v74_v24 = vmul.f32 %v127_v22, %v71_v23 }
 0x14a   :  { %95 = vadd.xlane.f32.xlu1 %v94_v17 }
 0x14e   :  { %89 = vadd.xlane.f32.xlu1 %v88_v19 }
 0x1d3   :  { %v79_v25 = vpop.xlane.xlu1 %78 }
 0x1d4   :  { %v80_v27 = vadd.f32 %v79_v25, %v74_v24 }
 0x1d6   :  { %82 = vst.msk [vmem:[#allocation3] sm:$0xff] %vm42_vm0, %v80_v27 }
 0x1d7   :  { %v96_v29 = vpop.xlane.xlu1 %95 }
 0x1d8   :  { %v97_v31 = vadd.f32 %v96_v29, %v93_v26 }
 0x1da   :  { %98 = vst.msk [vmem:[#allocation4] sm:$0xff] %vm42_vm0, %v97_v31 }
 0x1db   :  { %v90_v33 = vpop.xlane.xlu1 %89 }
 0x1dc   :  { %v91_v34 = vadd.f32 %v90_v33, %v86_v32 }
 0x1dd   :  { %v103_v35 = vld [vmem:[#allocation3] sm:$0xff] }
 0x1de   :  { %128 = vlog2.f32 %v103_v35  ;;  %92 = vst.msk [vmem:[#allocation5] sm:$0xff] %vm42_vm0, %v91_v34 }
 0x1e1   :  { %v106_v38 = vld [vmem:[#allocation4] sm:$0xff] }
 0x1e5   :  { %v108_v40 = vld [vmem:[#allocation5] sm:$0xff] }
 0x1e8   :  { %v129_v36 = vpop.eup %128 }
 0x1e9   :  { %v105_v37 = vmul.f32 0.6931472, %v129_v36 }
 0x1eb   :  { %v107_v39 = vmul.f32 %v106_v38, %v105_v37 }
 0x1ed   :  { %v109_v41 = vsub.f32 %v107_v39, %v108_v40 }
 0x1ef   :  { %110 = vst.msk [vmem:[%s249_s3] sm:$0xff] %vm42_vm0, %v109_v41 }
 0x1f0   :  { %115 = vsyncpa [#allocation7], 1 }
 0x1f1   :  { %116 = vsyncpa [#allocation9], 1 }

</bundles_post_ra>
